<compile_context>
chip_gen: v6e
topology: v6e:2x2x1
jax: 0.10.0
libtpu: 0.0.40
codegen_flags: <defaults>
</compile_context>

<pallas_src>
import jax
import jax.numpy as jnp
from jax.experimental import pallas as pl
from jax.experimental.pallas import tpu as pltpu


def _round_up(x, m):
    return (x + m - 1) // m * m


def inner_model_kernel(p_ref, x_ref, o_ref):
    # Param slab layout (all row starts sublane-aligned, all lane starts at 0):
    #   rows  0:8,  lanes 0:5  -> W_a (8,5)   folded Linear(8,5) weight
    #   row   8,    lanes 0:5  -> b_a (1,5)   folded bias
    #   rows 16:21, lanes 0:2  -> W_b (5,2)   final Linear weight (transposed)
    #   row  24,    lanes 0:2  -> b_b (1,2)   final bias
    x = x_ref[...]                                   # (TB, 8) f32
    wa = p_ref[0:8, 0:5]                             # (8, 5)
    ba = p_ref[8:9, 0:5]                             # (1, 5)
    wb = p_ref[16:21, 0:2]                           # (5, 2)
    bb = p_ref[24:25, 0:2]                           # (1, 2)

    h = jnp.dot(x, wa, preferred_element_type=jnp.float32) + ba   # MXU + VPU
    h = jnp.maximum(h, 0.0)                                       # ReLU (seq[2])
    o = jnp.dot(h, wb, preferred_element_type=jnp.float32) + bb   # MXU + VPU
    o_ref[...] = o.astype(o_ref.dtype)


def _pack_params(params):
    """Fold the pre-ReLU affine chain and pack everything into one VMEM slab."""
    w1, b1 = params["linear1.weight"], params["linear1.bias"]   # (3,8), (3,)
    w2, b2 = params["seq.0.weight"], params["seq.0.bias"]       # (4,3), (4,)
    w3, b3 = params["seq.1.weight"], params["seq.1.bias"]       # (5,4), (5,)
    w4, b4 = params["seq2.0.weight"], params["seq2.0.bias"]     # (2,5), (2,)

    # y = relu(((x@W1.T + b1)@W2.T + b2)@W3.T + b3) @ W4.T + b4
    wa = w1.T @ w2.T @ w3.T                      # (8, 5)
    ba = (b1 @ w2.T + b2) @ w3.T + b3            # (5,)
    wb = w4.T                                    # (5, 2)
    bb = b4                                      # (2,)

    slab = jnp.zeros((32, 128), jnp.float32)
    slab = slab.at[0:8, 0:5].set(wa)
    slab = slab.at[8, 0:5].set(ba)
    slab = slab.at[16:21, 0:2].set(wb)
    slab = slab.at[24, 0:2].set(bb)
    return slab


def inner_model_forward(x, params, *, tb=2048):
    """x: (B, 8) float32. params: dict of PyTorch-layout weights/biases."""
    B = x.shape[0]
    x = x.astype(jnp.float32)

    # Batch tile: single block for small B, 'tb'-row tiles otherwise.
    if B <= tb:
        TB = _round_up(max(B, 8), 8)
    else:
        TB = tb
    B_pad = _round_up(B, TB)
    if B_pad != B:
        x = jnp.pad(x, ((0, B_pad - B), (0, 0)))

    slab = _pack_params(params)
    grid = (pl.cdiv(B_pad, TB),)

    out = pl.pallas_call(
        inner_model_kernel,
        out_shape=jax.ShapeDtypeStruct((B_pad, 2), jnp.float32),
        grid=grid,
        in_specs=[
            # Params: one small resident slab, same block for every grid step.
            pl.BlockSpec((32, 128), lambda i: (0, 0)),
            # Activations: tile the batch; last dim equals full array dim (8).
            pl.BlockSpec((TB, 8), lambda i: (i, 0)),
        ],
        # Output block last dim (2) equals the full array dim, so this is the
        # minimal HBM writeback; a lane-dense padded slab would write 64x the
        # bytes for this memory-bound shape.
        out_specs=pl.BlockSpec((TB, 2), lambda i: (i, 0)),
        compiler_params=pltpu.CompilerParams(
            dimension_semantics=("parallel",)),
    )(slab, x)

    return out[:B]


def init_params(key):
    """Deterministic init matching the PyTorch module's parameter shapes."""
    shapes = {
        "linear1.weight": (3, 8), "linear1.bias": (3,),
        "seq.0.weight": (4, 3),   "seq.0.bias": (4,),
        "seq.1.weight": (5, 4),   "seq.1.bias": (5,),
        "seq2.0.weight": (2, 5),  "seq2.0.bias": (2,),
    }
    params = {}
    for name, shape in shapes.items():
        key, sub = jax.random.split(key)
        params[name] = jax.random.normal(sub, shape, dtype=jnp.float32) * 0.1
    return params


def reference_forward(x, params):
    """Plain-JAX reference of the PyTorch forward, for a sanity check."""
    h = x @ params["linear1.weight"].T + params["linear1.bias"]
    h = h @ params["seq.0.weight"].T + params["seq.0.bias"]
    h = h @ params["seq.1.weight"].T + params["seq.1.bias"]
    h = jnp.maximum(h, 0.0)
    h = h @ params["seq2.0.weight"].T + params["seq2.0.bias"]
    return h


if __name__ == "__main__":
    key = jax.random.PRNGKey(0)
    key, xk = jax.random.split(key)

    B = 30  # small batch; exercises batch padding (30 -> 32) and the grid path
    x = jax.random.normal(xk, (B, 8), dtype=jnp.float32)

    params = init_params(key)

    # tb=8 -> TB=8, grid=(4,) : exercises the batch-tiled, "parallel" grid path.
    out = inner_model_forward(x, params, tb=8)
    out = jax.block_until_ready(out)

    ref = reference_forward(x, params)
    assert out.shape == (B, 2), out.shape
    # Folding the affine chain reorders FP summation -> tiny (~1e-6) deltas.
    assert jnp.allclose(out, ref, atol=1e-4, rtol=1e-4), (out, ref)

    print("KERNEL_OK")
</pallas_src>

<mosaic_0001>
module attributes {stable_mosaic.version = 11 : i64} {
  func.func @inner_model_kernel(%arg0: i32, %arg1: memref<32x128xf32, #tpu.memory_space<vmem>>, %arg2: memref<8x8xf32, #tpu.memory_space<vmem>>, %arg3: memref<8x2xf32, #tpu.memory_space<vmem>>) attributes {dimension_semantics = [#tpu.dimension_semantics<parallel>], iteration_bounds = array<i64: 4>, scalar_prefetch = 0 : i64, scratch_operands = 0 : i64, tpu.core_type = #tpu.core_type<tc>, window_params = [{pipeline_mode = #tpu.pipeline_mode<synchronous>, transform_indices = @transform_0, window_bounds = array<i64: 32, 128>}, {transform_indices = @transform_1, window_bounds = array<i64: 8, 8>}, {transform_indices = @transform_2, window_bounds = array<i64: 8, 2>}]} {
    %c0 = arith.constant 0 : index
    %c0_0 = arith.constant 0 : index
    %0 = vector.load %arg2[%c0, %c0_0] : memref<8x8xf32, #tpu.memory_space<vmem>>, vector<8x8xf32>
    %c0_1 = arith.constant 0 : index
    %c0_2 = arith.constant 0 : index
    %1 = vector.load %arg1[%c0_1, %c0_2] : memref<32x128xf32, #tpu.memory_space<vmem>>, vector<8x5xf32>
    %c8 = arith.constant 8 : index
    %c0_3 = arith.constant 0 : index
    %2 = vector.load %arg1[%c8, %c0_3] : memref<32x128xf32, #tpu.memory_space<vmem>>, vector<1x5xf32>
    %c16 = arith.constant 16 : index
    %c0_4 = arith.constant 0 : index
    %3 = vector.load %arg1[%c16, %c0_4] : memref<32x128xf32, #tpu.memory_space<vmem>>, vector<5x2xf32>
    %c24 = arith.constant 24 : index
    %c0_5 = arith.constant 0 : index
    %4 = vector.load %arg1[%c24, %c0_5] : memref<32x128xf32, #tpu.memory_space<vmem>>, vector<1x2xf32>
    %cst = arith.constant dense<0.000000e+00> : vector<8x5xf32>
    %5 = tpu.matmul %0, %1, %cst {dimension_numbers = #tpu.dot_dimension_numbers<[1], [0], [0], [1], [0, 0, 1, 1], [], []>} : vector<8x8xf32>, vector<8x5xf32>, vector<8x5xf32> -> vector<8x5xf32>
    %6 = vector.broadcast %2 : vector<1x5xf32> to vector<8x5xf32>
    %7 = arith.addf %5, %6 : vector<8x5xf32>
    %cst_6 = arith.constant 0.000000e+00 : f32
    %8 = vector.broadcast %cst_6 : f32 to vector<8x5xf32>
    %9 = arith.maximumf %7, %8 : vector<8x5xf32>
    %cst_7 = arith.constant dense<0.000000e+00> : vector<8x2xf32>
    %10 = tpu.matmul %9, %3, %cst_7 {dimension_numbers = #tpu.dot_dimension_numbers<[1], [0], [0], [1], [0, 0, 1, 1], [], []>} : vector<8x5xf32>, vector<5x2xf32>, vector<8x2xf32> -> vector<8x2xf32>
    %11 = vector.broadcast %4 : vector<1x2xf32> to vector<8x2xf32>
    %12 = arith.addf %10, %11 : vector<8x2xf32>
    %c0_8 = arith.constant 0 : index
    %c0_9 = arith.constant 0 : index
    %13 = vector.load %arg3[%c0_8, %c0_9] : memref<8x2xf32, #tpu.memory_space<vmem>>, vector<8x2xf32>
    tpu.vector_store %arg3[%c0_8, %c0_9], %12 {strides = array<i32>} : memref<8x2xf32, #tpu.memory_space<vmem>>, vector<8x2xf32>,
    return
  }
  func.func @transform_0(%arg0: i32) -> (i32, i32) {
    %c0_i32 = arith.constant 0 : i32
    %c0_i32_0 = arith.constant 0 : i32
    %c0_i32_1 = arith.constant 0 : i32
    return %c0_i32, %c0_i32_0 : i32, i32
  }
  func.func @transform_1(%arg0: i32) -> (i32, i32) {
    %c0_i32 = arith.constant 0 : i32
    %c0_i32_0 = arith.constant 0 : i32
    return %arg0, %c0_i32 : i32, i32
  }
  func.func @transform_2(%arg0: i32) -> (i32, i32) {
    %c0_i32 = arith.constant 0 : i32
    %c0_i32_0 = arith.constant 0 : i32
    return %arg0, %c0_i32 : i32, i32
  }
}

</mosaic_0001>

<bundles_post_ra>
// kernel: tpu_custom_call.1
= control target key start
LH: loop header
LB: loop body
LE: loop exit
PB: predicated region body
PF: predicated region fallthrough
CT: control target
= control target key end

     0   :  { %s423_s9 = smov 0   ;;  %s452_s0 = inlined_call_operand.vmem [shape: f32[32,128], index: 0, kind: input, shape index: {}]   ;;  %s453_s1 = inlined_call_operand.vmem [shape: f32[32,8], index: 1, kind: input, shape index: {}]   ;;  %s454_s2 = inlined_call_operand.vmem [shape: f32[32,2], index: 2, kind: output, shape index: {}]  }
   0x1 LB: > { %s360_s10 = sadd.s32 4294967295, %s404_s9   ;;  %p364_p0 = scmp.ge.s32.totalorder %s404_s9, 1  ;;  %s404_s9 = sphi %s423_s9, %s12_s9  }
   0x2   : > { %p111_p1 = scmp.lt.s32.totalorder %s404_s9, 5 }
   0x4   : > { %p112_p2 = pnand %p364_p0, %p111_p1 }
   0x5   : > { %p131_p3 = scmp.lt.s32.totalorder (!%p112_p2), %s360_s10, 3 }
   0x6   : > { %115 = sbr.rel (%p112_p2) target bundleno = 408 (0x198), region = 28 }
   0xb   : > { %v140_v0 = vld [vmem:[%s452_s0] sm:$0xff]  ;;  %v406_v1 = vmov 0.0   ;;  %vm407_vm0 = vmmov 0   ;;  %s456_s10 = smov (!%p131_p3, %s360_s10), 3  ;;  %vm148_vm1 = vcmask 64512   ;;  %vm231_vm2 = vcmask 1044480  }
   0xc   : > { %378 = vmatprep.subr.mxu0 %v406_v1  ;;  %380 = vmatprep.mubr.msk.f32.mxu0 %vm407_vm0, %v406_v1  ;;  %s365_s13 = sshll.u32 %s456_s10, 3  ;;  %v142_v3 = vld [vmem:[%s452_s0 + $0x10] sm:$0x1f]  ;;  %v367_v4 = vld [vmem:[%s452_s0 + $0x8] ss:$0 sm:$0xff]  ;;  %vm227_vm3 = vcmask 39936  }
   0xd   : > { %379 = vmatpush3.msra.mxu0 %v140_v0  ;;  %383 = vmatprep.subr.mxu1 %v406_v1  ;;  %s134_s16 = scalar_lea.vmem %s453_s1, %s365_s13  ;;  %v369_v9 = vld [vmem:[%s452_s0 + $0x18] ss:$0 sm:$0xff]  ;;  %s138_s25 = scalar_lea.vmem %s454_s2, %s365_s13  ;;  %vm305_vm4 = vcmask 15360  }
   0xe   : > { %385 = vmatprep.mubr.msk.f32.mxu1 %vm407_vm0, %v406_v1  ;;  %v139_v2 = vld [vmem:[%s134_s16] sm:$0xff]  ;;  %384 = vmatpush3.msk.msra.mxu1 %vm231_vm2, %v142_v3 }
   0xf   : > { %381 = vmatmul.mubr.msk.f32.vlgmr.msra.gmra.mxu0 %vm148_vm1, %v139_v2 }
  0xcf   : > { %v218_v5 = vpop.f32.mrf.mxu0 }
  0xd0   : > { %v219_v6 = vadd.f32 %v367_v4, %v218_v5 }
  0xd1   : > { %v382_v7 = vpop.f32.mrf.mxu0 }
  0xd2   : > { %v222_v8 = vmax.f32 %v219_v6, 0.0 }
  0xd4   : > { %386 = vmatmul.mubr.msk.f32.vlgmr.msra.gmra.mxu1 %vm227_vm3, %v222_v8 }
 0x194   : > { %v301_v10 = vpop.f32.mrf.mxu1 }
 0x195   : > { %v302_v11 = vadd.f32 %v369_v9, %v301_v10 }
 0x196   : > { %v387_v12 = vpop.f32.mrf.mxu1 }
 0x197   : > { %306 = vst.msk [vmem:[%s138_s25] sm:$0xff] %vm305_vm4, %v302_v11 }
 0x198 PF: > { %s12_s9 = sadd.s32 1, %s404_s9  }
 0x199   : > { %p9_p4 = scmp.ge.s32.totalorder %s12_s9, 6  }
 0x19b   :  { %11 = sbr.rel (!%p9_p4) target bundleno = 1 (0x1), region = 58 }

</bundles_post_ra>
